<compile_context>
chip_gen: v7x
topology: tpu7x:2x2x1
jax: 0.10.0
libtpu: 0.0.40
codegen_flags: <defaults>
</compile_context>

<pallas_src>
import functools

import jax
import jax.numpy as jnp
from jax.experimental import pallas as pl
from jax.experimental.pallas import tpu as pltpu

Z_DIM = 20
IN_DIM = 784
HID_DIM = 300
HID_PAD = 384    # hidden dim zero-padded to a multiple of 128 (lane-dense)
OUT_PAD = 128    # output dim zero-padded to 128 (unmasked vst)


def _round_up(n, m):
    return ((n + m - 1) // m) * m


def _device_kind():
    try:
        return jax.devices()[0].device_kind.lower()
    except Exception:
        return ""


# ----------------------------------------------------------------------------
# Kernel
# ----------------------------------------------------------------------------
def qv_kernel(x_ref, w1_ref, b1_ref, w2_ref, b2_ref, o_ref, *,
              n_chunks, softplus_bf16):
    tile_b = x_ref.shape[0]
    sub = tile_b // n_chunks
    # Static sub-chunk loop: independent row chunks let the LLO scheduler
    # interleave the MXU phase (dots) of one chunk with the EUP/VPU phase
    # (softplus) of another instead of running dot1->softplus->dot2 serially.
    for c in range(n_chunks):
        rows = pl.ds(c * sub, sub)
        # fc1: bf16 inputs on the MXU, f32 accumulation.
        h = jnp.dot(x_ref[rows, :], w1_ref[...],
                    preferred_element_type=jnp.float32)
        h = h + b1_ref[...]
        if softplus_bf16:
            # v6e/v7x: bf16 EUP ~2x transcendental throughput; h1 is cast to
            # bf16 for the second matmul anyway.
            h = h.astype(jnp.bfloat16)
        # F.softplus (beta=1, threshold=20): x for x > 20, else log1p(exp(x)).
        h1 = jnp.where(h > 20.0, h, jnp.log1p(jnp.exp(jnp.minimum(h, 20.0))))
        h1 = h1.astype(jnp.bfloat16)
        # fc21: padded-to-128 output columns -> lane-dense store.
        out = jnp.dot(h1, w2_ref[...], preferred_element_type=jnp.float32)
        o_ref[rows, :] = (out + b2_ref[...]).astype(o_ref.dtype)


# ----------------------------------------------------------------------------
# Tiling heuristics (all static / trace-time)
# ----------------------------------------------------------------------------
def _pick_tile(B, tile_b, num_tc):
    tile = min(int(tile_b), _round_up(B, 16))
    tile = max(16, _round_up(tile, 16))          # bf16 sublane packing
    if num_tc > 1 and B >= num_tc * 16:
        # Guarantee >= num_tc grid steps so "parallel" shards across TCs.
        per_core = _round_up(pl.cdiv(_round_up(B, 16), num_tc), 16)
        tile = min(tile, per_core)
    if tile >= 256:
        tile = _round_up(tile, 128)              # MXU / sub-chunk friendly
    return tile


def _pick_chunks(tile):
    for c in (4, 3, 2):
        if tile % (c * 128) == 0:
            return c
    return 1


# ----------------------------------------------------------------------------
# One-time weight packing (call once, reuse for every forward)
# ----------------------------------------------------------------------------
def pack_params(w1_t, b1, w2_t, b2):
    """bf16 weights, hidden dim padded 300->384, fc21 padded 20->128.

    Padded hidden units see h = 0 + 0 -> softplus = ln2, but the matching
    zero rows of W2 kill their contribution; padded output columns are sliced
    away after the kernel.
    """
    w1_pad = jnp.zeros((IN_DIM, HID_PAD), jnp.bfloat16)
    w1_pad = w1_pad.at[:, :HID_DIM].set(w1_t.astype(jnp.bfloat16))
    b1_pad = jnp.zeros((1, HID_PAD), jnp.float32)
    b1_pad = b1_pad.at[:, :HID_DIM].set(
        b1.reshape(1, HID_DIM).astype(jnp.float32))
    w2_pad = jnp.zeros((HID_PAD, OUT_PAD), jnp.bfloat16)
    w2_pad = w2_pad.at[:HID_DIM, :Z_DIM].set(w2_t.astype(jnp.bfloat16))
    b2_pad = jnp.zeros((1, OUT_PAD), jnp.float32)
    b2_pad = b2_pad.at[:, :Z_DIM].set(b2.reshape(1, Z_DIM).astype(jnp.float32))
    return w1_pad, b1_pad, w2_pad, b2_pad


# ----------------------------------------------------------------------------
# Forward (jitted end-to-end: pad + cast + pallas_call + slice fuse together)
# ----------------------------------------------------------------------------
@functools.partial(jax.jit, static_argnames=("tile_b",))
def q_v_forward(x, packed_params, *, tile_b=1024):
    """logvar = fc21(softplus(fc1(x.view(-1, 784)))), f32 output (B, 20)."""
    w1_pad, b1_pad, w2_pad, b2_pad = packed_params

    x2 = x.reshape(-1, IN_DIM)
    B = x2.shape[0]

    kind = _device_kind()
    num_tc = 2 if any(t in kind for t in ("v7", "v5p", "v4")) else 1
    softplus_bf16 = ("v6" in kind) or ("v7" in kind)   # bf16 EUP only there

    tile = _pick_tile(B, tile_b, num_tc)
    n_chunks = _pick_chunks(tile)
    B_pad = _round_up(B, tile)
    if B_pad != B:
        x2 = jnp.pad(x2, ((0, B_pad - B), (0, 0)))
    x2_bf = x2.astype(jnp.bfloat16)

    grid = (B_pad // tile,)

    flops = 2 * B_pad * (IN_DIM * HID_PAD + HID_PAD * OUT_PAD)
    bytes_accessed = (
        x2_bf.size * 2
        + w1_pad.size * 2 + b1_pad.size * 4
        + w2_pad.size * 2 + b2_pad.size * 4
        + B_pad * OUT_PAD * 4
    )

    # Defaults fit every generation at tile<=1024; only raise the scoped VMEM
    # limit if the caller explicitly asks for bigger tiles (review: v5e's
    # default scoped limit is 16 MiB).
    vmem_limit = 64 * 1024 * 1024 if tile > 1024 else None

    kernel = functools.partial(qv_kernel, n_chunks=n_chunks,
                               softplus_bf16=softplus_bf16)

    out = pl.pallas_call(
        kernel,
        out_shape=jax.ShapeDtypeStruct((B_pad, OUT_PAD), jnp.float32),
        grid_spec=pltpu.PrefetchScalarGridSpec(
            num_scalar_prefetch=0,
            grid=grid,
            in_specs=[
                pl.BlockSpec((tile, IN_DIM), lambda i: (i, 0)),      # x tile (bf16)
                pl.BlockSpec((IN_DIM, HID_PAD), lambda i: (0, 0)),   # W1^T (bf16, VMEM-resident)
                pl.BlockSpec((1, HID_PAD), lambda i: (0, 0)),        # b1 (f32)
                pl.BlockSpec((HID_PAD, OUT_PAD), lambda i: (0, 0)),  # W2^T padded (bf16)
                pl.BlockSpec((1, OUT_PAD), lambda i: (0, 0)),        # b2 padded (f32)
            ],
            out_specs=pl.BlockSpec((tile, OUT_PAD), lambda i: (i, 0)),
        ),
        compiler_params=pltpu.CompilerParams(
            dimension_semantics=("parallel",),   # shards steps across TCs on megacore parts
            vmem_limit_bytes=vmem_limit,
        ),
        cost_estimate=pl.CostEstimate(
            flops=flops,
            transcendentals=2 * B_pad * HID_PAD,   # exp + log1p per hidden elem
            bytes_accessed=bytes_accessed,
        ),
    )(x2_bf, w1_pad, b1_pad, w2_pad, b2_pad)

    # Still inside the same jit -> fuses, no extra HBM round trip.
    return out[:B, :Z_DIM]


# ----------------------------------------------------------------------------
# Init + self-test
# ----------------------------------------------------------------------------
def init_params(key):
    # nn.Linear default init: U(-1/sqrt(fan_in), +1/sqrt(fan_in))
    k1, k2, k3, k4 = jax.random.split(key, 4)
    bnd1 = 1.0 / jnp.sqrt(IN_DIM)
    bnd2 = 1.0 / jnp.sqrt(HID_DIM)
    w1_t = jax.random.uniform(k1, (IN_DIM, HID_DIM), jnp.float32, -bnd1, bnd1)
    b1 = jax.random.uniform(k2, (1, HID_DIM), jnp.float32, -bnd1, bnd1)
    w2_t = jax.random.uniform(k3, (HID_DIM, Z_DIM), jnp.float32, -bnd2, bnd2)
    b2 = jax.random.uniform(k4, (1, Z_DIM), jnp.float32, -bnd2, bnd2)
    return w1_t, b1, w2_t, b2


if __name__ == "__main__":
    key = jax.random.PRNGKey(0)
    kx, kp = jax.random.split(key)
    # Small MNIST-like batch: NCHW (B, 1, 28, 28) -> flattens to (B, 784).
    # B deliberately NOT a multiple of the tile to exercise padding.
    B = 20
    x = jax.random.uniform(kx, (B, 1, 28, 28), jnp.float32)
    w1_t, b1, w2_t, b2 = init_params(kp)

    packed = pack_params(w1_t, b1, w2_t, b2)   # one-time packing
    logvar = q_v_forward(x, packed)
    logvar = jax.block_until_ready(logvar)

    # Pure-JAX f32 reference (bf16 matmul inputs in kernel -> loosened tol).
    x2 = x.reshape(-1, IN_DIM).astype(jnp.float32)
    pre = x2 @ w1_t + b1
    h1 = jnp.where(pre > 20.0, pre, jnp.log1p(jnp.exp(jnp.minimum(pre, 20.0))))
    ref = h1 @ w2_t + b2
    assert logvar.shape == (B, Z_DIM), logvar.shape
    assert jnp.allclose(logvar, ref, atol=5e-2, rtol=5e-2), (
        float(jnp.max(jnp.abs(logvar - ref))))

    print("KERNEL_OK")
</pallas_src>

<mosaic_0001>
module attributes {stable_mosaic.version = 11 : i64} {
  func.func @qv_kernel(%arg0: i32, %arg1: memref<32x784xbf16, #tpu.memory_space<vmem>>, %arg2: memref<784x384xbf16, #tpu.memory_space<vmem>>, %arg3: memref<1x384xf32, #tpu.memory_space<vmem>>, %arg4: memref<384x128xbf16, #tpu.memory_space<vmem>>, %arg5: memref<1x128xf32, #tpu.memory_space<vmem>>, %arg6: memref<32x128xf32, #tpu.memory_space<vmem>>) attributes {dimension_semantics = [#tpu.dimension_semantics<parallel>], iteration_bounds = array<i64: 1>, scalar_prefetch = 0 : i64, scratch_operands = 0 : i64, tpu.core_type = #tpu.core_type<tc>, window_params = [{transform_indices = @transform_0, window_bounds = array<i64: 32, 784>}, {pipeline_mode = #tpu.pipeline_mode<synchronous>, transform_indices = @transform_1, window_bounds = array<i64: 784, 384>}, {pipeline_mode = #tpu.pipeline_mode<synchronous>, transform_indices = @transform_2, window_bounds = array<i64: 1, 384>}, {pipeline_mode = #tpu.pipeline_mode<synchronous>, transform_indices = @transform_3, window_bounds = array<i64: 384, 128>}, {pipeline_mode = #tpu.pipeline_mode<synchronous>, transform_indices = @transform_4, window_bounds = array<i64: 1, 128>}, {transform_indices = @transform_5, window_bounds = array<i64: 32, 128>}]} {
    %c0 = arith.constant 0 : index
    %c0_0 = arith.constant 0 : index
    %0 = vector.load %arg1[%c0, %c0_0] : memref<32x784xbf16, #tpu.memory_space<vmem>>, vector<32x784xbf16>
    %c0_1 = arith.constant 0 : index
    %c0_2 = arith.constant 0 : index
    %1 = vector.load %arg2[%c0_1, %c0_2] : memref<784x384xbf16, #tpu.memory_space<vmem>>, vector<784x384xbf16>
    %cst = arith.constant dense<0.000000e+00> : vector<32x384xf32>
    %2 = tpu.matmul %0, %1, %cst {dimension_numbers = #tpu.dot_dimension_numbers<[1], [0], [0], [1], [0, 0, 1, 1], [], []>} : vector<32x784xbf16>, vector<784x384xbf16>, vector<32x384xf32> -> vector<32x384xf32>
    %c0_3 = arith.constant 0 : index
    %c0_4 = arith.constant 0 : index
    %3 = vector.load %arg3[%c0_3, %c0_4] : memref<1x384xf32, #tpu.memory_space<vmem>>, vector<1x384xf32>
    %4 = vector.broadcast %3 : vector<1x384xf32> to vector<32x384xf32>
    %5 = arith.addf %2, %4 : vector<32x384xf32>
    %cst_5 = arith.constant 2.000000e+01 : f32
    %6 = vector.broadcast %cst_5 : f32 to vector<32x384xf32>
    %7 = arith.cmpf ogt, %5, %6 : vector<32x384xf32>
    %cst_6 = arith.constant 2.000000e+01 : f32
    %8 = vector.broadcast %cst_6 : f32 to vector<32x384xf32>
    %9 = arith.minimumf %5, %8 : vector<32x384xf32>
    %10 = math.exp %9 : vector<32x384xf32>
    %11 = math.log1p %10 : vector<32x384xf32>
    %12 = arith.select %7, %5, %11 : vector<32x384xi1>, vector<32x384xf32>
    %13 = arith.truncf %12 : vector<32x384xf32> to vector<32x384xbf16>
    %c0_7 = arith.constant 0 : index
    %c0_8 = arith.constant 0 : index
    %14 = vector.load %arg4[%c0_7, %c0_8] : memref<384x128xbf16, #tpu.memory_space<vmem>>, vector<384x128xbf16>
    %cst_9 = arith.constant dense<0.000000e+00> : vector<32x128xf32>
    %15 = tpu.matmul %13, %14, %cst_9 {dimension_numbers = #tpu.dot_dimension_numbers<[1], [0], [0], [1], [0, 0, 1, 1], [], []>} : vector<32x384xbf16>, vector<384x128xbf16>, vector<32x128xf32> -> vector<32x128xf32>
    %c0_10 = arith.constant 0 : index
    %c0_11 = arith.constant 0 : index
    %16 = vector.load %arg5[%c0_10, %c0_11] : memref<1x128xf32, #tpu.memory_space<vmem>>, vector<1x128xf32>
    %17 = vector.broadcast %16 : vector<1x128xf32> to vector<32x128xf32>
    %18 = arith.addf %15, %17 : vector<32x128xf32>
    %c0_12 = arith.constant 0 : index
    %c0_13 = arith.constant 0 : index
    %19 = vector.load %arg6[%c0_12, %c0_13] : memref<32x128xf32, #tpu.memory_space<vmem>>, vector<32x128xf32>
    tpu.vector_store %arg6[%c0_12, %c0_13], %18 {strides = array<i32>} : memref<32x128xf32, #tpu.memory_space<vmem>>, vector<32x128xf32>,
    return
  }
  func.func @transform_0(%arg0: i32) -> (i32, i32) {
    %c0_i32 = arith.constant 0 : i32
    %c0_i32_0 = arith.constant 0 : i32
    return %arg0, %c0_i32 : i32, i32
  }
  func.func @transform_1(%arg0: i32) -> (i32, i32) {
    %c0_i32 = arith.constant 0 : i32
    %c0_i32_0 = arith.constant 0 : i32
    %c0_i32_1 = arith.constant 0 : i32
    return %c0_i32, %c0_i32_0 : i32, i32
  }
  func.func @transform_2(%arg0: i32) -> (i32, i32) {
    %c0_i32 = arith.constant 0 : i32
    %c0_i32_0 = arith.constant 0 : i32
    %c0_i32_1 = arith.constant 0 : i32
    return %c0_i32, %c0_i32_0 : i32, i32
  }
  func.func @transform_3(%arg0: i32) -> (i32, i32) {
    %c0_i32 = arith.constant 0 : i32
    %c0_i32_0 = arith.constant 0 : i32
    %c0_i32_1 = arith.constant 0 : i32
    return %c0_i32, %c0_i32_0 : i32, i32
  }
  func.func @transform_4(%arg0: i32) -> (i32, i32) {
    %c0_i32 = arith.constant 0 : i32
    %c0_i32_0 = arith.constant 0 : i32
    %c0_i32_1 = arith.constant 0 : i32
    return %c0_i32, %c0_i32_0 : i32, i32
  }
  func.func @transform_5(%arg0: i32) -> (i32, i32) {
    %c0_i32 = arith.constant 0 : i32
    %c0_i32_0 = arith.constant 0 : i32
    return %arg0, %c0_i32 : i32, i32
  }
}

</mosaic_0001>

<bundles_post_ra>
// kernel: q_v_forward.1
= control target key start
LH: loop header
LB: loop body
LE: loop exit
PB: predicated region body
PF: predicated region fallthrough
CT: control target
= control target key end

     0   :  { %v2660_v1 = vmov 0   ;;  %vm1104_vm0 = vcmask 130048   ;;  %s3495_s1 = inlined_call_operand.vmem [shape: bf16[784,384], index: 1, kind: input, shape index: {}]   ;;  %s3496_s0 = inlined_call_operand.vmem [shape: bf16[32,784], index: 0, kind: input, shape index: {}]   ;;  %s3497_s2 = inlined_call_operand.vmem [shape: f32[1,384], index: 2, kind: input, shape index: {}]   ;;  %s3498_s3 = inlined_call_operand.vmem [shape: bf16[384,128], index: 3, kind: input, shape index: {}]   ;;  %s3499_s4 = inlined_call_operand.vmem [shape: f32[1,128], index: 4, kind: input, shape index: {}]   ;;  %s3500_s5 = inlined_call_operand.vmem [shape: f32[32,128], index: 5, kind: output, shape index: {}]  }
   0x1   :  { %v2372_v0 = vld [vmem:[%s3495_s1 + $0x4] ss:$12 sps:$4 sm:$0xff]   ;;  %1302 = vmatprep.mubr.bf16.mxu1 %v2660_v1  ;;  %v2374_v2 = vld [vmem:[%s3495_s1] ss:$12 sps:$4 sm:$0xff]   ;;  %v2377_v4 = vld [vmem:[%s3495_s1 + $0x1c] ss:$12 sps:$4 sm:$0xff]  }
   0x2   :  { %1111 = vmatprep.subr.bf16.mxu0 %v2372_v0  ;;  %v2375_v3 = vld [vmem:[%s3495_s1 + $0x484] ss:$12 sps:$4 sm:$0xff]   ;;  %v2379_v5 = vld [vmem:[%s3495_s1 + $0x480] ss:$12 sps:$4 sm:$0xff]   ;;  %v2381_v7 = vld [vmem:[%s3495_s1 + $0xc8] ss:$12 sps:$4 sm:$0xff]  }
   0x3   :  { %1112 = vmatpush1.bf16.msra.mxu0 %v2374_v2  ;;  %v2380_v6 = vld [vmem:[%s3495_s1 + $0x18] ss:$12 sps:$4 sm:$0xff]   ;;  %1270 = vmatprep.subr.bf16.mxu1 %v2375_v3  ;;  %v2382_v8 = vld [vmem:[%s3495_s1 + $0x34] ss:$12 sps:$4 sm:$0xff]   ;;  %v2386_v11 = vld [vmem:[%s3495_s1 + $0x30] ss:$12 sps:$4 sm:$0xff]  }
   0x4   :  { %1113 = vmatprep.subr.bf16.mxu0 %v2377_v4  ;;  %1271 = vmatpush1.bf16.msra.mxu1 %v2379_v5  ;;  %v2718_v9 = vld [vmem:[%s3496_s0 + $0x18] ss:$28 sps:$4 sm:$0xff]   ;;  %v2387_v12 = vld [vmem:[%s3495_s1 + $0xe0] ss:$12 sps:$4 sm:$0xff]   ;;  %v2393_v17 = vld [vmem:[%s3495_s1 + $0x64] ss:$12 sps:$4 sm:$0xff]  }
   0x5   :  { %2188 = vmatprep.subr.bf16.mxu1 %v2381_v7  ;;  %v2385_v10 = vld [vmem:[%s3495_s1 + $0x8] ss:$12 sps:$4 sm:$0xff]   ;;  %v2388_v13 = vld [vmem:[%s3495_s1 + $0x4c] ss:$12 sps:$4 sm:$0xff]   ;;  %v2397_v20 = vld [vmem:[%s3495_s1 + $0x110] ss:$12 sps:$4 sm:$0xff]  }
   0x6   :  { %v2390_v14 = vld [vmem:[%s3495_s1 + $0x20] ss:$12 sps:$4 sm:$0xff]   ;;  %v2391_v15 = vld [vmem:[%s3495_s1 + $0x48] ss:$12 sps:$4 sm:$0xff]   ;;  %v2392_v16 = vld [vmem:[%s3495_s1 + $0xf8] ss:$12 sps:$4 sm:$0xff]  }
   0x7   :  { %1114 = vmatpush1.bf16.msra.mxu0 %v2380_v6  ;;  %2159 = vmatmul.mubr.msk.bf16.vlgmr.msra.gmra.mrb[0].mxu1 %vm1104_vm0, %v2718_v9  ;;  %v2395_v18 = vld [vmem:[%s3495_s1 + $0x38] ss:$12 sps:$4 sm:$0xff]   ;;  %v2396_v19 = vld [vmem:[%s3495_s1 + $0x60] ss:$12 sps:$4 sm:$0xff]   ;;  %v2398_v21 = vld [vmem:[%s3495_s1 + $0x7c] ss:$12 sps:$4 sm:$0xff]  }
   0x8   :  { %1115 = vmatprep.subr.bf16.mxu0 %v2382_v8  ;;  %2189 = vmatpush3.bf16.msra.mxu1 %v2385_v10  ;;  %v2400_v22 = vld [vmem:[%s3495_s1 + $0x50] ss:$12 sps:$4 sm:$0xff]   ;;  %v2401_v23 = vld [vmem:[%s3495_s1 + $0x78] ss:$12 sps:$4 sm:$0xff]   ;;  %v2402_v24 = vld [vmem:[%s3495_s1 + $0x128] ss:$12 sps:$4 sm:$0xff]  }
   0x9   :  { %1312 = vmatprep.mubr.bf16.mxu1 %v2660_v1  ;;  %2190 = vmatprep.subr.bf16.mxu1 %v2387_v12  ;;  %v2403_v25 = vld [vmem:[%s3495_s1 + $0x94] ss:$12 sps:$4 sm:$0xff]   ;;  %v2406_v28 = vld [vmem:[%s3495_s1 + $0x90] ss:$12 sps:$4 sm:$0xff]   ;;  %v2408_v29 = vld [vmem:[%s3495_s1 + $0xac] ss:$12 sps:$4 sm:$0xff]  }
   0xa   :  { %v2405_v26 = vld [vmem:[%s3495_s1 + $0x68] ss:$12 sps:$4 sm:$0xff]   ;;  %v2407_v27 = vld [vmem:[%s3495_s1 + $0x140] ss:$12 sps:$4 sm:$0xff]   ;;  %v2412_v32 = vld [vmem:[%s3495_s1 + $0x158] ss:$12 sps:$4 sm:$0xff]  }
   0xb   :  { %1116 = vmatpush1.bf16.msra.mxu0 %v2386_v11  ;;  %v2410_v30 = vld [vmem:[%s3495_s1 + $0x80] ss:$12 sps:$4 sm:$0xff]   ;;  %v2411_v31 = vld [vmem:[%s3495_s1 + $0xa8] ss:$12 sps:$4 sm:$0xff]   ;;  %v2413_v34 = vld [vmem:[%s3495_s1 + $0xc4] ss:$12 sps:$4 sm:$0xff]  }
   0xc   :  { %1117 = vmatprep.subr.bf16.mxu0 %v2388_v13  ;;  %2191 = vmatpush3.bf16.msra.mxu1 %v2390_v14  ;;  %v2794_v33 = vld [vmem:[%s3496_s0 + $0x50] ss:$28 sps:$4 sm:$0xff]   ;;  %v2416_v35 = vld [vmem:[%s3495_s1 + $0x98] ss:$12 sps:$4 sm:$0xff]   ;;  %v2419_v38 = vld [vmem:[%s3495_s1 + $0xdc] ss:$12 sps:$4 sm:$0xff]  }
   0xd   :  { %2192 = vmatprep.subr.bf16.mxu1 %v2392_v16  ;;  %v2418_v36 = vld [vmem:[%s3495_s1 + $0x170] ss:$12 sps:$4 sm:$0xff]   ;;  %v2417_v37 = vld [vmem:[%s3495_s1 + $0xc0] ss:$12 sps:$4 sm:$0xff]   ;;  %v2422_v40 = vld [vmem:[%s3495_s1 + $0xd8] ss:$12 sps:$4 sm:$0xff]  }
   0xe   :  { %v2421_v39 = vld [vmem:[%s3495_s1 + $0xb0] ss:$12 sps:$4 sm:$0xff]   ;;  %v2425_v41 = vld [vmem:[%s3496_s0 + $0x4] ss:$28 sps:$4 sm:$0xff]   ;;  %v2426_v42 = vld [vmem:[%s3495_s1 + $0x248] ss:$12 sps:$4 sm:$0xff]  }
   0xf   :  { %1118 = vmatpush1.bf16.msra.mxu0 %v2391_v15  ;;  %2160 = vmatmul.mubr.msk.bf16.gmra.mrb[4].mxu1 %vm1104_vm0, %v2794_v33  ;;  %v2828_v43 = vld [vmem:[%s3496_s0] ss:$28 sps:$4 sm:$0xff]   ;;  %v2429_v45 = vld [vmem:[%s3495_s1 + $0x188] ss:$12 sps:$4 sm:$0xff]   ;;  %v2432_v48 = vld [vmem:[%s3495_s1 + $0x10c] ss:$12 sps:$4 sm:$0xff]  }
  0x10   :  { %1119 = vmatprep.subr.bf16.mxu0 %v2393_v17  ;;  %2193 = vmatpush3.bf16.msra.mxu1 %v2395_v18  ;;  %v2427_v44 = vld [vmem:[%s3495_s1 + $0xf4] ss:$12 sps:$4 sm:$0xff]   ;;  %v2430_v47 = vld [vmem:[%s3495_s1 + $0xf0] ss:$12 sps:$4 sm:$0xff]   ;;  %v2436_v50 = vld [vmem:[%s3495_s1 + $0x278] ss:$12 sps:$4 sm:$0xff]  }
  0x11   :  { %2194 = vmatprep.subr.bf16.mxu1 %v2397_v20  ;;  %1355 = vmatprep.mubr.bf16.mxu1 %v2425_v41  ;;  %v2431_v46 = vld [vmem:[%s3495_s1 + $0x260] ss:$12 sps:$4 sm:$0xff]   ;;  %v2435_v51 = vld [vmem:[%s3495_s1 + $0x108] ss:$12 sps:$4 sm:$0xff]   ;;  %v2437_v52 = vld [vmem:[%s3495_s1 + $0x124] ss:$12 sps:$4 sm:$0xff]  }
  0x12   :  { %1143 = vmatprep.mubr.bf16.mxu0 %v2425_v41  ;;  %v2434_v49 = vld [vmem:[%s3495_s1 + $0x1a0] ss:$12 sps:$4 sm:$0xff]   ;;  %v2439_v53 = vld [vmem:[%s3495_s1 + $0x1b8] ss:$12 sps:$4 sm:$0xff]   ;;  %v2441_v54 = vld [vmem:[%s3495_s1 + $0x290] ss:$12 sps:$4 sm:$0xff]  }
  0x13   :  { %1120 = vmatpush1.bf16.msra.mxu0 %v2396_v19  ;;  %v2440_v55 = vld [vmem:[%s3495_s1 + $0x120] ss:$12 sps:$4 sm:$0xff]   ;;  %v2442_v56 = vld [vmem:[%s3495_s1 + $0x13c] ss:$12 sps:$4 sm:$0xff]   ;;  %v2445_v59 = vld [vmem:[%s3495_s1 + $0x138] ss:$12 sps:$4 sm:$0xff]  }
  0x14   :  { %1121 = vmatprep.subr.bf16.mxu0 %v2398_v21  ;;  %2195 = vmatpush3.bf16.msra.mxu1 %v2400_v22  ;;  %v2444_v57 = vld [vmem:[%s3495_s1 + $0x1d0] ss:$12 sps:$4 sm:$0xff]   ;;  %v2446_v58 = vld [vmem:[%s3495_s1 + $0x2a8] ss:$12 sps:$4 sm:$0xff]   ;;  %v2451_v62 = vld [vmem:[%s3495_s1 + $0x2c0] ss:$12 sps:$4 sm:$0xff]  }
  0x15   :  { %2196 = vmatprep.subr.bf16.mxu1 %v2402_v24  ;;  %v2447_v60 = vld [vmem:[%s3495_s1 + $0x154] ss:$12 sps:$4 sm:$0xff]   ;;  %v2456_v63 = vld [vmem:[%s3496_s0 + $0x3c] ss:$28 sps:$4 sm:$0xff]   ;;  %v2461_v6 = vld [vmem:[%s3495_s1 + $0x184] ss:$12 sps:$4 sm:$0xff]  }
  0x16   :  { %v2449_v61 = vld [vmem:[%s3495_s1 + $0x1e8] ss:$12 sps:$4 sm:$0xff]   ;;  %v2450_v0 = vld [vmem:[%s3495_s1 + $0x150] ss:$12 sps:$4 sm:$0xff]   ;;  %v2452_v1 = vld [vmem:[%s3495_s1 + $0x16c] ss:$12 sps:$4 sm:$0xff]  }
  0x17   :  { %1122 = vmatpush1.bf16.msra.mxu0 %v2401_v23  ;;  %v2454_v2 = vld [vmem:[%s3495_s1 + $0x200] ss:$12 sps:$4 sm:$0xff]   ;;  %v2462_v3 = vld [vmem:[%s3496_s0 + $0x38] ss:$28 sps:$4 sm:$0xff]   ;;  %v2464_v10 = vld [vmem:[%s3495_s1 + $0x2f0] ss:$12 sps:$4 sm:$0xff]  }
  0x18   :  { %1123 = vmatprep.subr.bf16.mxu0 %v2403_v25  ;;  %2197 = vmatpush3.bf16.msra.mxu1 %v2405_v26  ;;  %v2458_v4 = vld [vmem:[%s3495_s1 + $0x2d8] ss:$12 sps:$4 sm:$0xff]   ;;  %v2455_v5 = vld [vmem:[%s3495_s1 + $0x168] ss:$12 sps:$4 sm:$0xff]   ;;  %v2459_v7 = vld [vmem:[%s3495_s1 + $0x180] ss:$12 sps:$4 sm:$0xff]  }
  0x19   :  { %2198 = vmatprep.subr.bf16.mxu1 %v2407_v27  ;;  %v2463_v8 = vld [vmem:[%s3495_s1 + $0x218] ss:$12 sps:$4 sm:$0xff]   ;;  %v2471_v11 = vld [vmem:[%s3496_s0 + $0xc] ss:$28 sps:$4 sm:$0xff]   ;;  %v2468_v13 = vld [vmem:[%s3495_s1 + $0x230] ss:$12 sps:$4 sm:$0xff]  }
  0x1a   :  { %v2467_v12 = vld [vmem:[%s3495_s1 + $0x19c] ss:$12 sps:$4 sm:$0xff]   ;;  %v2465_v15 = vld [vmem:[%s3495_s1 + $0x198] ss:$12 sps:$4 sm:$0xff]   ;;  %v2475_v17 = vld [vmem:[%s3495_s1 + $0x1b4] ss:$12 sps:$4 sm:$0xff]  }
  0x1b   :  { %1124 = vmatpush1.bf16.msra.mxu0 %v2406_v28  ;;  %v2472_v14 = vld [vmem:[%s3495_s1 + $0x3c8] ss:$12 sps:$4 sm:$0xff]   ;;  %v2477_v19 = vld [vmem:[%s3495_s1 + $0x3e0] ss:$12 sps:$4 sm:$0xff]   ;;  %v2473_v20 = vld [vmem:[%s3495_s1 + $0x1b0] ss:$12 sps:$4 sm:$0xff]  }
  0x1c   :  { %1125 = vmatprep.subr.bf16.mxu0 %v2408_v29  ;;  %2199 = vmatpush3.bf16.msra.mxu1 %v2410_v30  ;;  %v2940_v16 = vld [vmem:[%s3496_s0 + $0x8] ss:$28 sps:$4 sm:$0xff]   ;;  %v2480_v21 = vld [vmem:[%s3495_s1 + $0x1cc] ss:$12 sps:$4 sm:$0xff]   ;;  %v2487_v27 = vld [vmem:[%s3495_s1 + $0x410] ss:$12 sps:$4 sm:$0xff]  }
  0x1d   :  { %2200 = vmatprep.subr.bf16.mxu1 %v2412_v32  ;;  %v2476_v18 = vld [vmem:[%s3495_s1 + $0x308] ss:$12 sps:$4 sm:$0xff]   ;;  %v2481_v22 = vld [vmem:[%s3495_s1 + $0x320] ss:$12 sps:$4 sm:$0xff]   ;;  %v2482_v23 = vld [vmem:[%s3495_s1 + $0x3f8] ss:$12 sps:$4 sm:$0xff]  }
  0x1e   :  { %v2478_v24 = vld [vmem:[%s3495_s1 + $0x1c8] ss:$12 sps:$4 sm:$0xff]   ;;  %v2485_v25 = vld [vmem:[%s3495_s1 + $0x1e4] ss:$12 sps:$4 sm:$0xff]   ;;  %v2483_v28 = vld [vmem:[%s3495_s1 + $0x1e0] ss:$12 sps:$4 sm:$0xff]  }
  0x1f   :  { %1126 = vmatpush1.bf16.msra.mxu0 %v2411_v31  ;;  %v2486_v26 = vld [vmem:[%s3495_s1 + $0x338] ss:$12 sps:$4 sm:$0xff]   ;;  %v2490_v29 = vld [vmem:[%s3495_s1 + $0x1fc] ss:$12 sps:$4 sm:$0xff]   ;;  %v2501_v41 = vld [vmem:[%s3495_s1 + $0x380] ss:$12 sps:$4 sm:$0xff]  }
  0x20   :  { %1127 = vmatprep.subr.bf16.mxu0 %v2413_v34  ;;  %2201 = vmatpush3.bf16.msra.mxu1 %v2416_v35  ;;  %v2488_v30 = vld [vmem:[%s3495_s1 + $0x1f8] ss:$12 sps:$4 sm:$0xff]   ;;  %v2491_v31 = vld [vmem:[%s3495_s1 + $0x350] ss:$12 sps:$4 sm:$0xff]   ;;  %v2492_v32 = vld [vmem:[%s3495_s1 + $0x428] ss:$12 sps:$4 sm:$0xff]  }
  0x21   :  { %2202 = vmatprep.subr.bf16.mxu1 %v2418_v36  ;;  %v2495_v34 = vld [vmem:[%s3495_s1 + $0x214] ss:$12 sps:$4 sm:$0xff]  }
  0x22   :  { %v2997_v35 = vld [vmem:[%s3496_s0 + $0x44] ss:$28 sps:$4 sm:$0xff]  }
  0x23   :  { %1128 = vmatpush1.bf16.msra.mxu0 %v2417_v37  ;;  %v3002_v36 = vld [vmem:[%s3496_s0 + $0x40] ss:$28 sps:$4 sm:$0xff]   ;;  %v2496_v37 = vld [vmem:[%s3495_s1 + $0x368] ss:$12 sps:$4 sm:$0xff]  }
  0x24   :  { %1129 = vmatprep.subr.bf16.mxu0 %v2419_v38  ;;  %2203 = vmatpush3.bf16.msra.mxu1 %v2421_v39  ;;  %v2497_v38 = vld [vmem:[%s3495_s1 + $0x440] ss:$12 sps:$4 sm:$0xff]   ;;  %v2493_v39 = vld [vmem:[%s3495_s1 + $0x210] ss:$12 sps:$4 sm:$0xff]  }
  0x25   :  { %2216 = vmatprep.subr.bf16.mxu1 %v2426_v42  ;;  %v2505_v42 = vld [vmem:[%s3495_s1 + $0x458] ss:$12 sps:$4 sm:$0xff]  }
  0x27   :  { %1130 = vmatpush1.bf16.msra.mxu0 %v2422_v40  ;;  %1356 = vmatmul.mubr.bf16.vlgmr.msra.gmra.mrb[8].mxu1 %v2828_v43  ;;  %v2500_v40 = vld [vmem:[%s3495_s1 + $0x22c] ss:$12 sps:$4 sm:$0xff]  }
  0x28   :  { %1131 = vmatprep.subr.bf16.mxu0 %v2427_v44  ;;  %2217 = vmatpush3.bf16.msra.mxu1 %v2429_v45  ;;  %v2508_v44 = vld [vmem:[%s3495_s1 + $0x244] ss:$12 sps:$4 sm:$0xff]  }
  0x29   :  { %2218 = vmatprep.subr.bf16.mxu1 %v2431_v46  ;;  %1363 = vmatprep.mubr.bf16.mxu1 %v2456_v63  ;;  %v3033_v45 = vld [vmem:[%s3496_s0 + $0x14] ss:$28 sps:$4 sm:$0xff]   ;;  %v2509_v46 = vld [vmem:[%s3495_s1 + $0x398] ss:$12 sps:$4 sm:$0xff]  }
  0x2b   :  { %1132 = vmatpush1.bf16.msra.mxu0 %v2430_v47  ;;  %v2510_v47 = vld [vmem:[%s3495_s1 + $0x470] ss:$12 sps:$4 sm:$0xff]  }
  0x2c   :  { %1133 = vmatprep.subr.bf16.mxu0 %v2432_v48  ;;  %2219 = vmatpush3.bf16.msra.mxu1 %v2434_v49  ;;  %v2506_v48 = vld [vmem:[%s3495_s1 + $0x240] ss:$12 sps:$4 sm:$0xff]   ;;  %v2513_v49 = vld [vmem:[%s3495_s1 + $0x25c] ss:$12 sps:$4 sm:$0xff]  }
  0x2d   :  { %2220 = vmatprep.subr.bf16.mxu1 %v2436_v50  ;;  %v2511_v50 = vld [vmem:[%s3495_s1 + $0x258] ss:$12 sps:$4 sm:$0xff]  }
  0x2f   :  { %1134 = vmatpush1.bf16.msra.mxu0 %v2435_v51  ;;  %1364 = vmatmul.mubr.bf16.gmra.mrb[12].mxu1 %v2462_v3  ;;  %v2514_v51 = vld [vmem:[%s3495_s1 + $0x3b0] ss:$12 sps:$4 sm:$0xff]  }
  0x30   :  { %1135 = vmatprep.subr.bf16.mxu0 %v2437_v52  ;;  %2221 = vmatpush3.bf16.msra.mxu1 %v2439_v53  ;;  %v2530_v52 = vld [vmem:[%s3495_s1 + $0x488] ss:$12 sps:$4 sm:$0xff]   ;;  %v3060_v53 = vld [vmem:[%s3496_s0 + $0x10] ss:$28 sps:$4 sm:$0xff]  }
  0x31   :  { %2222 = vmatprep.subr.bf16.mxu1 %v2441_v54  ;;  %1404 = vmatprep.mubr.bf16.mxu1 %v2471_v11  ;;  %v2520_v54 = vld [vmem:[%s3495_s1 + $0x274] ss:$12 sps:$4 sm:$0xff]  }
  0x33   :  { %1136 = vmatpush1.bf16.msra.mxu0 %v2440_v55  ;;  %v3068_v55 = vld [vmem:[%s3496_s0 + $0x4c] ss:$28 sps:$4 sm:$0xff]  }
  0x34   :  { %1137 = vmatprep.subr.bf16.mxu0 %v2442_v56  ;;  %2223 = vmatpush3.bf16.msra.mxu1 %v2444_v57  ;;  %v2518_v56 = vld [vmem:[%s3495_s1 + $0x270] ss:$12 sps:$4 sm:$0xff]   ;;  %v2523_v57 = vld [vmem:[%s3495_s1 + $0x28c] ss:$12 sps:$4 sm:$0xff]  }
  0x35   :  { %2224 = vmatprep.subr.bf16.mxu1 %v2446_v58  ;;  %v2521_v58 = vld [vmem:[%s3495_s1 + $0x288] ss:$12 sps:$4 sm:$0xff]  }
  0x37   :  { %1138 = vmatpush1.bf16.msra.mxu0 %v2445_v59  ;;  %v3084_v59 = vld [vmem:[%s3496_s0 + $0x48] ss:$28 sps:$4 sm:$0xff]  }
  0x38   :  { %1139 = vmatprep.subr.bf16.mxu0 %v2447_v60  ;;  %2225 = vmatpush3.bf16.msra.mxu1 %v2449_v61  ;;  %v2529_v60 = vld [vmem:[%s3495_s1 + $0x2a4] ss:$12 sps:$4 sm:$0xff]   ;;  %v2527_v61 = vld [vmem:[%s3495_s1 + $0x2a0] ss:$12 sps:$4 sm:$0xff]  }
  0x39   :  { %2226 = vmatprep.subr.bf16.mxu1 %v2451_v62  ;;  %v2533_v62 = vld [vmem:[%s3495_s1 + $0x2bc] ss:$12 sps:$4 sm:$0xff]  }
  0x3b   :  { %1140 = vmatpush1.bf16.msra.mxu0 %v2450_v0  ;;  %v2536_v0 = vld [vmem:[%s3495_s1 + $0x2d4] ss:$12 sps:$4 sm:$0xff]  }
  0x3c   :  { %1141 = vmatprep.subr.bf16.mxu0 %v2452_v1  ;;  %2227 = vmatpush3.bf16.msra.mxu1 %v2454_v2  ;;  %v2534_v1 = vld [vmem:[%s3495_s1 + $0x2d0] ss:$12 sps:$4 sm:$0xff]   ;;  %v2537_v2 = vld [vmem:[%s3495_s1 + $0x2e8] ss:$12 sps:$4 sm:$0xff]  }
  0x3d   :  { %2228 = vmatprep.subr.bf16.mxu1 %v2458_v4  ;;  %v2545_v4 = vld [vmem:[%s3495_s1 + $0x31c] ss:$12 sps:$4 sm:$0xff]  }
  0x3f   :  { %1142 = vmatpush1.bf16.msra.mxu0 %v2455_v5  ;;  %v2543_v5 = vld [vmem:[%s3495_s1 + $0x318] ss:$12 sps:$4 sm:$0xff]  }
  0x40   :  { %1164 = vmatprep.subr.bf16.mxu0 %v2461_v6  ;;  %2229 = vmatpush3.bf16.msra.mxu1 %v2463_v8  ;;  %v2548_v6 = vld [vmem:[%s3495_s1 + $0x334] ss:$12 sps:$4 sm:$0xff]   ;;  %v2551_v8 = vld [vmem:[%s3495_s1 + $0x34c] ss:$12 sps:$4 sm:$0xff]  }
  0x41   :  { %2230 = vmatprep.subr.bf16.mxu1 %v2464_v10  ;;  %v2549_v10 = vld [vmem:[%s3495_s1 + $0x348] ss:$12 sps:$4 sm:$0xff]  }
  0x42   :  { %1144 = vmatmul.mubr.bf16.vlgmr.msra.gmra.mrb[0].mxu0 %v2828_v43  ;;  %v2498_v43 = vld [vmem:[%s3495_s1 + $0x228] ss:$12 sps:$4 sm:$0xff]  }
  0x43   :  { %1165 = vmatpush1.bf16.msra.mxu0 %v2459_v7  ;;  %1153 = vmatprep.mubr.bf16.mxu0 %v2456_v63  ;;  %v2531_v63 = vld [vmem:[%s3495_s1 + $0x2b8] ss:$12 sps:$4 sm:$0xff]   ;;  %v2546_v7 = vld [vmem:[%s3495_s1 + $0x330] ss:$12 sps:$4 sm:$0xff]  }
  0x44   :  { %1166 = vmatprep.subr.bf16.mxu0 %v2467_v12  ;;  %2231 = vmatpush3.bf16.msra.mxu1 %v2468_v13  ;;  %v2552_v12 = vld [vmem:[%s3495_s1 + $0x360] ss:$12 sps:$4 sm:$0xff]   ;;  %v2557_v13 = vld [vmem:[%s3495_s1 + $0x37c] ss:$12 sps:$4 sm:$0xff]  }
  0x45   :  { %2244 = vmatprep.subr.bf16.mxu1 %v2472_v14  ;;  %v2555_v14 = vld [vmem:[%s3495_s1 + $0x378] ss:$12 sps:$4 sm:$0xff]  }
  0x47   :  { %1167 = vmatpush1.bf16.msra.mxu0 %v2465_v15  ;;  %1405 = vmatmul.mubr.bf16.vlgmr.msra.gmra.mrb[16].mxu1 %v2940_v16  ;;  %v2560_v15 = vld [vmem:[%s3495_s1 + $0x394] ss:$12 sps:$4 sm:$0xff]  }
  0x48   :  { %1168 = vmatprep.subr.bf16.mxu0 %v2475_v17  ;;  %2245 = vmatpush3.bf16.msra.mxu1 %v2476_v18  ;;  %v2563_v17 = vld [vmem:[%s3495_s1 + $0x3ac] ss:$12 sps:$4 sm:$0xff]   ;;  %v2561_v18 = vld [vmem:[%s3495_s1 + $0x3a8] ss:$12 sps:$4 sm:$0xff]  }
  0x49   :  { %2246 = vmatprep.subr.bf16.mxu1 %v2477_v19  ;;  %1412 = vmatprep.mubr.bf16.mxu1 %v2997_v35  ;;  %v2566_v19 = vld [vmem:[%s3495_s1 + $0x3c4] ss:$12 sps:$4 sm:$0xff]  }
  0x4a   :  { %1154 = vmatmul.mubr.bf16.gmra.mrb[4].mxu0 %v2462_v3  ;;  %v2542_v3 = vld [vmem:[%s3495_s1 + $0x304] ss:$12 sps:$4 sm:$0xff]  }
  0x4b   :  { %1169 = vmatpush1.bf16.msra.mxu0 %v2473_v20  ;;  %1196 = vmatprep.mubr.bf16.mxu0 %v2471_v11  ;;  %v2554_v11 = vld [vmem:[%s3495_s1 + $0x364] ss:$12 sps:$4 sm:$0xff]   ;;  %v2564_v20 = vld [vmem:[%s3495_s1 + $0x3c0] ss:$12 sps:$4 sm:$0xff]  }
  0x4c   :  { %1170 = vmatprep.subr.bf16.mxu0 %v2480_v21  ;;  %2247 = vmatpush3.bf16.msra.mxu1 %v2481_v22  ;;  %v2569_v21 = vld [vmem:[%s3495_s1 + $0x3dc] ss:$12 sps:$4 sm:$0xff]   ;;  %v2567_v22 = vld [vmem:[%s3495_s1 + $0x3d8] ss:$12 sps:$4 sm:$0xff]  }
  0x4d   :  { %2248 = vmatprep.subr.bf16.mxu1 %v2482_v23  ;;  %v2572_v23 = vld [vmem:[%s3495_s1 + $0x3f4] ss:$12 sps:$4 sm:$0xff]  }
  0x4f   :  { %1171 = vmatpush1.bf16.msra.mxu0 %v2478_v24  ;;  %1413 = vmatmul.mubr.bf16.gmra.mrb[20].mxu1 %v3002_v36  ;;  %v2570_v24 = vld [vmem:[%s3495_s1 + $0x3f0] ss:$12 sps:$4 sm:$0xff]  }
  0x50   :  { %1172 = vmatprep.subr.bf16.mxu0 %v2485_v25  ;;  %2249 = vmatpush3.bf16.msra.mxu1 %v2486_v26  ;;  %v2575_v25 = vld [vmem:[%s3495_s1 + $0x40c] ss:$12 sps:$4 sm:$0xff]   ;;  %v2573_v26 = vld [vmem:[%s3495_s1 + $0x408] ss:$12 sps:$4 sm:$0xff]  }
  0x51   :  { %2250 = vmatprep.subr.bf16.mxu1 %v2487_v27  ;;  %1453 = vmatprep.mubr.bf16.mxu1 %v3033_v45  ;;  %v2578_v27 = vld [vmem:[%s3495_s1 + $0x424] ss:$12 sps:$4 sm:$0xff]  }
  0x53   :  { %1173 = vmatpush1.bf16.msra.mxu0 %v2483_v28  ;;  %v2576_v28 = vld [vmem:[%s3495_s1 + $0x420] ss:$12 sps:$4 sm:$0xff]  }
  0x54   :  { %1174 = vmatprep.subr.bf16.mxu0 %v2490_v29  ;;  %2251 = vmatpush3.bf16.msra.mxu1 %v2491_v31  ;;  %v2581_v29 = vld [vmem:[%s3495_s1 + $0x43c] ss:$12 sps:$4 sm:$0xff]   ;;  %v2584_v31 = vld [vmem:[%s3495_s1 + $0x454] ss:$12 sps:$4 sm:$0xff]  }
  0x55   :  { %2252 = vmatprep.subr.bf16.mxu1 %v2492_v32  ;;  %v2582_v32 = vld [vmem:[%s3495_s1 + $0x450] ss:$12 sps:$4 sm:$0xff]  }
  0x57   :  { %1175 = vmatpush1.bf16.msra.mxu0 %v2488_v30  ;;  %v2579_v30 = vld [vmem:[%s3495_s1 + $0x438] ss:$12 sps:$4 sm:$0xff]  }
  0x58   :  { %1176 = vmatprep.subr.bf16.mxu0 %v2495_v34  ;;  %2253 = vmatpush3.bf16.msra.mxu1 %v2496_v37  ;;  %v2587_v34 = vld [vmem:[%s3495_s1 + $0x46c] ss:$12 sps:$4 sm:$0xff]  }
  0x59   :  { %2254 = vmatprep.subr.bf16.mxu1 %v2497_v38 }
  0x5b   :  { %1177 = vmatpush1.bf16.msra.mxu0 %v2493_v39 }
  0x5c   :  { %1178 = vmatprep.subr.bf16.mxu0 %v2500_v40  ;;  %2255 = vmatpush3.bf16.msra.mxu1 %v2501_v41 }
  0x5d   :  { %2256 = vmatprep.subr.bf16.mxu1 %v2505_v42 }
  0x5f   :  { %1179 = vmatpush1.bf16.msra.mxu0 %v2498_v43 }
  0x60   :  { %1180 = vmatprep.subr.bf16.mxu0 %v2508_v44  ;;  %2257 = vmatpush3.bf16.msra.mxu1 %v2509_v46 }
  0x61   :  { %2258 = vmatprep.subr.bf16.mxu1 %v2510_v47 }
  0x63   :  { %1181 = vmatpush1.bf16.msra.mxu0 %v2506_v48 }
  0x64   :  { %1182 = vmatprep.subr.bf16.mxu0 %v2513_v49  ;;  %2259 = vmatpush3.bf16.msra.mxu1 %v2514_v51 }
  0x65   :  { %2313 = vmatprep.subr.bf16.mxu1 %v2530_v52 }
  0x67   :  { %1183 = vmatpush1.bf16.msra.mxu0 %v2511_v50  ;;  %1454 = vmatmul.mubr.bf16.vlgmr.msra.gmra.mrb[24].mxu1 %v3060_v53  ;;  %v235_v50 = vlaneseq }
  0x68   :  { %1184 = vmatprep.subr.bf16.mxu0 %v2520_v54  ;;  %1461 = vmatprep.mubr.bf16.mxu1 %v3068_v55 }
  0x69   :  { %2314 = vmatpush3.bf16.msra.mxu1 %v2530_v52  ;;  %v3234_v52 = vshrl.u32 %v235_v50, 7 }
  0x6b   :  { %1185 = vmatpush1.bf16.msra.mxu0 %v2518_v56 }
  0x6c   :  { %1186 = vmatprep.subr.bf16.mxu0 %v2523_v57 }
  0x6f   :  { %1187 = vmatpush1.bf16.msra.mxu0 %v2521_v58  ;;  %1462 = vmatmul.mubr.bf16.gmra.mrb[28].mxu1 %v3084_v59  ;;  %v245_v58 = vsub.s32 2, %v3234_v52 }
  0x70   :  { %1188 = vmatprep.subr.bf16.mxu0 %v2529_v60  ;;  %2315 = vmatprep.mubr.msk.bf16.mxu1 %vm1104_vm0, %v2718_v9  ;;  %v2539_v9 = vld [vmem:[%s3495_s1 + $0x2ec] ss:$12 sps:$4 sm:$0xff]  }
  0x73   :  { %1189 = vmatpush1.bf16.msra.mxu0 %v2527_v61 }
  0x74   :  { %1190 = vmatprep.subr.bf16.mxu0 %v2533_v62 }
  0x77   :  { %1191 = vmatpush1.bf16.msra.mxu0 %v2531_v63  ;;  %2316 = vmatmul.mubr.msk.bf16.vlgmr.msra.gmra.mrb[32].mxu1 %vm1104_vm0, %v2794_v33  ;;  %v2540_v33 = vld [vmem:[%s3495_s1 + $0x300] ss:$12 sps:$4 sm:$0xff]  }
  0x78   :  { %1192 = vmatprep.subr.bf16.mxu0 %v2536_v0 }
  0x7b   :  { %1193 = vmatpush1.bf16.msra.mxu0 %v2534_v1 }
  0x7c   :  { %1194 = vmatprep.subr.bf16.mxu0 %v2539_v9 }
  0x7f   :  { %1195 = vmatpush1.bf16.msra.mxu0 %v2537_v2 }
  0x80   :  { %1217 = vmatprep.subr.bf16.mxu0 %v2542_v3  ;;  %v2588_v3 = vld [vmem:[%s3498_s3 + $0x40] sm:$0xff]  }
  0x81   :  { %2275 = vmatprep.subr.bf16.mxu1 %v2588_v3 }
  0x82   :  { %1197 = vmatmul.mubr.bf16.vlgmr.msra.gmra.mrb[0].mxu0 %v2940_v16  ;;  %v2558_v16 = vld [vmem:[%s3495_s1 + $0x390] ss:$12 sps:$4 sm:$0xff]  }
  0x83   :  { %1218 = vmatpush1.bf16.msra.mxu0 %v2540_v33  ;;  %1206 = vmatprep.mubr.bf16.mxu0 %v2997_v35  ;;  %v2585_v35 = vld [vmem:[%s3495_s1 + $0x468] ss:$12 sps:$4 sm:$0xff]  }
  0x84   :  { %1219 = vmatprep.subr.bf16.mxu0 %v2545_v4 }
  0x87   :  { %1220 = vmatpush1.bf16.msra.mxu0 %v2543_v5  ;;  %v2589_v5 = vld [vmem:[%s3498_s3] sm:$0xff]  }
  0x88   :  { %1221 = vmatprep.subr.bf16.mxu0 %v2548_v6  ;;  %2276 = vmatpush3.bf16.msra.mxu1 %v2589_v5 }
  0x8a   :  { %1207 = vmatmul.mubr.bf16.gmra.mrb[4].mxu0 %v3002_v36 }
  0x8b   :  { %1222 = vmatpush1.bf16.msra.mxu0 %v2546_v7  ;;  %1249 = vmatprep.mubr.bf16.mxu0 %v3033_v45  ;;  %v2590_v7 = vld [vmem:[%s3498_s3 + $0x48] sm:$0xff]  }
  0x8c   :  { %1223 = vmatprep.subr.bf16.mxu0 %v2551_v8  ;;  %v2591_v8 = vld [vmem:[%s3498_s3 + $0x8] sm:$0xff]   ;;  %2277 = vmatprep.subr.bf16.mxu1 %v2590_v7 }
  0x8d   :  { %2278 = vmatpush3.bf16.msra.mxu1 %v2591_v8 }
  0x8f   :  { %1224 = vmatpush1.bf16.msra.mxu0 %v2549_v10  ;;  %v2592_v10 = vld [vmem:[%s3498_s3 + $0x50] sm:$0xff]  }
  0x90   :  { %1225 = vmatprep.subr.bf16.mxu0 %v2554_v11  ;;  %v2593_v11 = vld [vmem:[%s3498_s3 + $0x10] sm:$0xff]   ;;  %2279 = vmatprep.subr.bf16.mxu1 %v2592_v10 }
  0x91   :  { %2280 = vmatpush3.bf16.msra.mxu1 %v2593_v11 }
  0x93   :  { %1226 = vmatpush1.bf16.msra.mxu0 %v2552_v12 }
  0x94   :  { %1227 = vmatprep.subr.bf16.mxu0 %v2557_v13 }
  0x97   :  { %1228 = vmatpush1.bf16.msra.mxu0 %v2555_v14  ;;  %v2594_v14 = vld [vmem:[%s3498_s3 + $0x58] sm:$0xff]  }
  0x98   :  { %1229 = vmatprep.subr.bf16.mxu0 %v2560_v15  ;;  %2281 = vmatprep.subr.bf16.mxu1 %v2594_v14 }
  0x9b   :  { %1230 = vmatpush1.bf16.msra.mxu0 %v2558_v16  ;;  %v2595_v16 = vld [vmem:[%s3498_s3 + $0x18] sm:$0xff]  }
  0x9c   :  { %1231 = vmatprep.subr.bf16.mxu0 %v2563_v17  ;;  %2282 = vmatpush3.bf16.msra.mxu1 %v2595_v16 }
  0x9f   :  { %1232 = vmatpush1.bf16.msra.mxu0 %v2561_v18 }
  0xa0   :  { %1233 = vmatprep.subr.bf16.mxu0 %v2566_v19 }
  0xa3   :  { %1234 = vmatpush1.bf16.msra.mxu0 %v2564_v20 }
  0xa4   :  { %1235 = vmatprep.subr.bf16.mxu0 %v2569_v21 }
  0xa7   :  { %1236 = vmatpush1.bf16.msra.mxu0 %v2567_v22 }
  0xa8   :  { %1237 = vmatprep.subr.bf16.mxu0 %v2572_v23  ;;  %v2596_v23 = vld [vmem:[%s3498_s3 + $0x60] sm:$0xff]  }
  0xa9   :  { %2283 = vmatprep.subr.bf16.mxu1 %v2596_v23 }
  0xab   :  { %1238 = vmatpush1.bf16.msra.mxu0 %v2570_v24  ;;  %v2597_v24 = vld [vmem:[%s3498_s3 + $0x20] sm:$0xff]  }
  0xac   :  { %1239 = vmatprep.subr.bf16.mxu0 %v2575_v25  ;;  %2284 = vmatpush3.bf16.msra.mxu1 %v2597_v24 }
  0xaf   :  { %1240 = vmatpush1.bf16.msra.mxu0 %v2573_v26  ;;  %v2598_v26 = vld [vmem:[%s3498_s3 + $0x68] sm:$0xff]  }
  0xb0   :  { %1241 = vmatprep.subr.bf16.mxu0 %v2578_v27  ;;  %v2599_v27 = vld [vmem:[%s3498_s3 + $0x28] sm:$0xff]   ;;  %2285 = vmatprep.subr.bf16.mxu1 %v2598_v26 }
  0xb1   :  { %2286 = vmatpush3.bf16.msra.mxu1 %v2599_v27 }
  0xb3   :  { %1242 = vmatpush1.bf16.msra.mxu0 %v2576_v28  ;;  %v2600_v28 = vld [vmem:[%s3498_s3 + $0x70] sm:$0xff]  }
  0xb4   :  { %1243 = vmatprep.subr.bf16.mxu0 %v2581_v29  ;;  %v2601_v29 = vld [vmem:[%s3498_s3 + $0x30] sm:$0xff]   ;;  %2287 = vmatprep.subr.bf16.mxu1 %v2600_v28 }
  0xb5   :  { %2288 = vmatpush3.bf16.msra.mxu1 %v2601_v29 }
  0xb7   :  { %1244 = vmatpush1.bf16.msra.mxu0 %v2579_v30  ;;  %v2602_v30 = vld [vmem:[%s3498_s3 + $0x78] sm:$0xff]  }
  0xb8   :  { %1245 = vmatprep.subr.bf16.mxu0 %v2584_v31  ;;  %2289 = vmatprep.subr.bf16.mxu1 %v2602_v30 }
  0xbb   :  { %1246 = vmatpush1.bf16.msra.mxu0 %v2582_v32  ;;  %v2603_v32 = vld [vmem:[%s3498_s3 + $0x38] sm:$0xff]  }
  0xbc   :  { %1247 = vmatprep.subr.bf16.mxu0 %v2587_v34  ;;  %2290 = vmatpush3.bf16.msra.mxu1 %v2603_v32 }
  0xbf   :  { %1248 = vmatpush1.bf16.msra.mxu0 %v2585_v35 }
  0xc2   :  { %1250 = vmatmul.mubr.bf16.vlgmr.msra.gmra.mrb[0].mxu0 %v3060_v53 }
  0xc3   :  { %1259 = vmatprep.mubr.bf16.mxu0 %v3068_v55 }
  0xca   :  { %1260 = vmatmul.mubr.bf16.gmra.mrb[4].mxu0 %v3084_v59  ;;  %v3240_v59 = vld [vmem:[%s3497_s2] sm:$0x7] }
  0xcb   :  { %v246_v60 = vrot.slane %v3240_v59, %v245_v58 }
  0xda   :  { %v3218_v36 = vpop.f32.mrb[0].mxu1 }
  0xdb   :  { %v3220_v37 = vpop.f32.mrb[1].mxu1 }
  0xdc   :  { %v3222_v38 = vpop.f32.mrb[2].mxu1 }
  0xdd   :  { %v3224_v39 = vpop.f32.mrb[3].mxu1 }
  0xe2   :  { %v3226_v40 = vpop.f32.mrb[4].mxu1 }
  0xe3   :  { %v3228_v41 = vpop.f32.mrb[5].mxu1 }
  0xe4   :  { %v3230_v42 = vpop.f32.mrb[6].mxu1 }
  0xe5   :  { %v3232_v43 = vpop.f32.mrb[7].mxu1 }
  0xfa   :  { %v2204_v44 = vpop.f32.mrb[8].mxu1 }
  0xfb   :  { %v2205_v45 = vpop.f32.mrb[9].mxu1 }
  0xfc   :  { %v2206_v46 = vadd.f32 %v2205_v45, %v2204_v44  ;;  %v2207_v47 = vpop.f32.mrb[10].mxu1 }
  0xfd   :  { %v2208_v48 = vpop.f32.mrb[11].mxu1 }
  0xfe   :  { %v2209_v49 = vadd.f32 %v2208_v48, %v2207_v47  ;;  %v1358_v61 = vadd.f32 %v2206_v46, %v246_v60  ;;  %v3294_v48 = vld [vmem:[%s3498_s3 + $0x80] sm:$0xff]  }
  0xff   :  { %2319 = vmatprep.subr.bf16.mxu1 %v3294_v48 }
 0x100   :  { %v1361_v0 = vadd.f32 %v2209_v49, %v246_v60 }
 0x102   :  { %v2210_v51 = vpop.f32.mrb[12].mxu1 }
 0x103   :  { %v2211_v53 = vpop.f32.mrb[13].mxu1 }
 0x104   :  { %v2212_v54 = vadd.f32 %v2211_v53, %v2210_v51  ;;  %v2213_v55 = vpop.f32.mrb[14].mxu1 }
 0x105   :  { %v2214_v56 = vpop.f32.mrb[15].mxu1 }
 0x106   :  { %v2215_v57 = vadd.f32 %v2214_v56, %v2213_v55  ;;  %v1366_v12 = vadd.f32 %v2212_v54, %v246_v60 }
 0x108   :  { %v1369_v17 = vadd.f32 %v2215_v57, %v246_v60 }
 0x11a   :  { %v2232_v62 = vpop.f32.mrb[16].mxu1 }
 0x11b   :  { %v2233_v63 = vpop.f32.mrb[17].mxu1 }
 0x11c   :  { %v2234_v1 = vadd.f32 %v2233_v63, %v2232_v62  ;;  %v2235_v9 = vpop.f32.mrb[18].mxu1 }
 0x11d   :  { %v2236_v2 = vpop.f32.mrb[19].mxu1 }
 0x11e   :  { %v1407_v33 = vadd.f32 %v2234_v1, %v1358_v61  ;;  %v2237_v4 = vadd.f32 %v2236_v2, %v2235_v9 }
 0x120   :  { %v1410_v6 = vadd.f32 %v2237_v4, %v1361_v0 }
 0x122   :  { %v2238_v13 = vpop.f32.mrb[20].mxu1 }
 0x123   :  { %v2239_v15 = vpop.f32.mrb[21].mxu1 }
 0x124   :  { %v2240_v18 = vadd.f32 %v2239_v15, %v2238_v13  ;;  %v2241_v19 = vpop.f32.mrb[22].mxu1 }
 0x125   :  { %v2242_v20 = vpop.f32.mrb[23].mxu1 }
 0x126   :  { %v1415_v21 = vadd.f32 %v2240_v18, %v1366_v12  ;;  %v2243_v22 = vadd.f32 %v2242_v20, %v2241_v19 }
 0x128   :  { %v1418_v25 = vadd.f32 %v2243_v22, %v1369_v17 }
 0x13a   :  { %v2260_v31 = vpop.f32.mrb[24].mxu1 }
 0x13b   :  { %v2261_v34 = vpop.f32.mrb[25].mxu1 }
 0x13c   :  { %v2262_v35 = vadd.f32 %v2261_v34, %v2260_v31  ;;  %v2263_v44 = vpop.f32.mrb[26].mxu1 }
 0x13d   :  { %v2264_v45 = vpop.f32.mrb[27].mxu1 }
 0x13e   :  { %v2265_v46 = vadd.f32 %v2264_v45, %v2263_v44  ;;  %v1456_v47 = vadd.f32 %v2262_v35, %v1407_v33 }
 0x140   :  { %v1459_v49 = vadd.f32 %v2265_v46, %v1410_v6 }
 0x142   :  { %v2266_v50 = vpop.f32.mrb[28].mxu1 }
 0x143   :  { %v2267_v51 = vpop.f32.mrb[29].mxu1 }
 0x144   :  { %v2268_v53 = vadd.f32 %v2267_v51, %v2266_v50  ;;  %v2269_v54 = vpop.f32.mrb[30].mxu1 }
 0x145   :  { %v2270_v55 = vpop.f32.mrb[31].mxu1 }
 0x146   :  { %v2271_v56 = vadd.f32 %v2270_v55, %v2269_v54  ;;  %v1464_v57 = vadd.f32 %v2268_v53, %v1415_v21 }
 0x148   :  { %v1467_v58 = vadd.f32 %v2271_v56, %v1418_v25 }
 0x14a   :  { %v2317_v60 = vpop.f32.mrb[32].mxu1 }
 0x14b   :  { %v1513_v61 = vadd.f32 %v2317_v60, %v1464_v57  ;;  %v1504_v62 = vpop.f32.mrb[33].mxu1 }
 0x14c   :  { %v3297_v63 = vadd.f32 %v1504_v62, %v1456_v47  ;;  %v2318_v0 = vpop.f32.mrb[34].mxu1 }
 0x14d   :  { %v1539_v1 = vmin.f32 %v1513_v61, 20.0  ;;  %v3299_v9 = vadd.f32 %v2318_v0, %v1467_v58  ;;  %v1507_v2 = vpop.f32.mrb[35].mxu1  ;;  %vm1527_vm2 = vcmp.gt.f32.partialorder %v1513_v61, 20.0 }
 0x14e   :  { %v1533_v3 = vmin.f32 %v3297_v63, 20.0  ;;  %v3302_v33 = vadd.f32 %v1507_v2, %v1459_v49  ;;  %vm1521_vm4 = vcmp.gt.f32.partialorder %v3297_v63, 20.0 }
 0x14f   :  { %v1559_v4 = vmul.f32 1.442695, %v1539_v1  ;;  %v1542_v5 = vmin.f32 %v3299_v9, 20.0  ;;  %vm1530_vm6 = vcmp.gt.f32.partialorder %v3299_v9, 20.0 }
 0x150   :  { %v1547_v6 = vmul.f32 1.442695, %v1533_v3  ;;  %v1536_v7 = vmin.f32 %v3302_v33, 20.0  ;;  %vm1524_vm8 = vcmp.gt.f32.partialorder %v3302_v33, 20.0 }
 0x151   :  { %2612 = vpow2.f32 %v1559_v4  ;;  %v1565_v8 = vmul.f32 1.442695, %v1542_v5  ;;  %v237_v4 = vsub.s32 0, %v3234_v52  ;;  %v241_v5 = vsub.s32 1, %v3234_v52 }
 0x152   :  { %2614 = vpow2.f32 %v1547_v6  ;;  %v1553_v10 = vmul.f32 1.442695, %v1536_v7 }
 0x153   :  { %2616 = vpow2.f32 %v1565_v8  ;;  %v242_v6 = vrot.slane %v3240_v59, %v241_v5 }
 0x154   :  { %2618 = vpow2.f32 %v1553_v10 }
 0x15b   :  { %v2613_v11 = vpop.eup %2612 }
 0x15c   :  { %v2615_v12 = vpop.eup %2614  ;;  %v1639_v13 = vadd.f32 1.0, %v2613_v11  ;;  %v1642_v18 = vmul.f32 -0.5, %v2613_v11  ;;  %v1645_v24 = vand.u32 2147483647, %v2613_v11 }
 0x15d   :  { %v2617_v14 = vpop.eup %2616  ;;  %v1585_v15 = vadd.f32 1.0, %v2615_v12  ;;  %v1588_v19 = vmul.f32 -0.5, %v2615_v12  ;;  %v1591_v27 = vand.u32 2147483647, %v2615_v12 }
 0x15e   :  { %v2619_v16 = vpop.eup %2618  ;;  %2620 = vlog2.f32 %v1639_v13  ;;  %v1666_v17 = vadd.f32 1.0, %v2617_v14  ;;  %v1669_v21 = vmul.f32 -0.5, %v2617_v14  ;;  %v1643_v22 = vadd.f32 1.0, %v1642_v18 }
 0x15f   :  { %2622 = vlog2.f32 %v1585_v15  ;;  %v1612_v20 = vadd.f32 1.0, %v2619_v16  ;;  %v1615_v23 = vmul.f32 -0.5, %v2619_v16  ;;  %v1589_v25 = vadd.f32 1.0, %v1588_v19 }
 0x160   :  { %2624 = vlog2.f32 %v1666_v17  ;;  %v1670_v26 = vadd.f32 1.0, %v1669_v21  ;;  %v1672_v28 = vand.u32 2147483647, %v2617_v14  ;;  %v1644_v29 = vmul.f32 %v2613_v11, %v1643_v22 }
 0x161   :  { %2626 = vlog2.f32 %v1612_v20  ;;  %v1616_v30 = vadd.f32 1.0, %v1615_v23  ;;  %vm3306_vm1 = vcmp.lt.f32.partialorder %v1645_v24, 0.0004427343  ;;  %v1590_v34 = vmul.f32 %v2615_v12, %v1589_v25 }
 0x162   :  { %v1618_v35 = vand.u32 2147483647, %v2619_v16  ;;  %v1671_v46 = vmul.f32 %v2617_v14, %v1670_v26  ;;  %vm3310_vm3 = vcmp.lt.f32.partialorder %v1591_v27, 0.0004427343  ;;  %vm1673_vm5 = vcmp.lt.f32.partialorder %v1672_v28, 0.0004427343 }
 0x163   :  { %v1617_v54 = vmul.f32 %v2619_v16, %v1616_v30 }
 0x164   :  { %vm1619_vm7 = vcmp.lt.f32.partialorder %v1618_v35, 0.0004427343 }
 0x168   :  { %v2621_v31 = vpop.eup %2620 }
 0x169   :  { %v2623_v44 = vpop.eup %2622  ;;  %v1641_v45 = vmul.f32 0.6931472, %v2621_v31 }
 0x16a   :  { %v2625_v49 = vpop.eup %2624  ;;  %v1587_v50 = vmul.f32 0.6931472, %v2623_v44 }
 0x16b   :  { %v1647_v51 = vsel %vm3306_vm1, %v1644_v29, %v1641_v45  ;;  %v1668_v53 = vmul.f32 0.6931472, %v2625_v49  ;;  %v2627_v55 = vpop.eup %2626 }
 0x16c   :  { %v3318_v56 = vsel %vm1527_vm2, %v1513_v61, %v1647_v51  ;;  %v1593_v57 = vsel %vm3310_vm3, %v1590_v34, %v1587_v50  ;;  %v1614_v60 = vmul.f32 0.6931472, %v2627_v55 }
 0x16d   :  { %v1674_v58 = vsel %vm1673_vm5, %v1671_v46, %v1668_v53  ;;  %v3327_v0 = vsel %vm1521_vm4, %v3297_v63, %v1593_v57 }
 0x16e   :  { %v3324_v62 = vsel %vm1530_vm6, %v3299_v9, %v1674_v58  ;;  %v1620_v2 = vsel %vm1619_vm7, %v1617_v54, %v1614_v60  ;;  %v238_v9 = vrot.slane %v3240_v59, %v237_v4 }
 0x16f   :  { %v1692_v1 = vpack.c.bf16 %v3324_v62, %v3318_v56  ;;  %v3332_v61 = vsel %vm1524_vm8, %v3302_v33, %v1620_v2 }
 0x170   :  { %v1689_v3 = vpack.c.bf16 %v3332_v61, %v3327_v0  ;;  %v2611_v0 = vld [vmem:[%s3498_s3 + $0xb8] sm:$0xff]  }
 0x195   :  { %v1251_v63 = vpop.f32.mrb[0].mxu0 }
 0x196   :  { %v2339_v7 = vadd.f32 %v1251_v63, %v238_v9  ;;  %v1253_v8 = vpop.f32.mrb[1].mxu0 }
 0x197   :  { %v2341_v10 = vadd.f32 %v1253_v8, %v242_v6  ;;  %v1255_v11 = vpop.f32.mrb[2].mxu0 }
 0x198   :  { %v3341_v12 = vadd.f32 %v2339_v7, %v3218_v36  ;;  %v2343_v33 = vadd.f32 %v1255_v11, %v238_v9  ;;  %v1257_v13 = vpop.f32.mrb[3].mxu0 }
 0x199   :  { %v3344_v14 = vadd.f32 %v2341_v10, %v3220_v37  ;;  %v2345_v15 = vadd.f32 %v1257_v13, %v242_v6 }
 0x19a   :  { %v1531_v52 = vmin.f32 %v3341_v12, 20.0  ;;  %v3348_v16 = vadd.f32 %v2343_v33, %v3222_v38  ;;  %vm1519_vm9 = vcmp.gt.f32.partialorder %v3341_v12, 20.0 }
 0x19b   :  { %v1532_v59 = vmin.f32 %v3344_v14, 20.0  ;;  %v3352_v17 = vadd.f32 %v2345_v15, %v3224_v39  ;;  %vm1520_vm12 = vcmp.gt.f32.partialorder %v3344_v14, 20.0 }
 0x19c   :  { %v1543_v18 = vmul.f32 1.442695, %v1531_v52  ;;  %v1534_v36 = vmin.f32 %v3348_v16, 20.0  ;;  %vm1522_vm10 = vcmp.gt.f32.partialorder %v3348_v16, 20.0 }
 0x19d   :  { %v1545_v19 = vmul.f32 1.442695, %v1532_v59  ;;  %v1535_v20 = vmin.f32 %v3352_v17, 20.0  ;;  %v1261_v21 = vpop.f32.mrb[4].mxu0  ;;  %vm1523_vm13 = vcmp.gt.f32.partialorder %v3352_v17, 20.0 }
 0x19e   :  { %2628 = vpow2.f32 %v1543_v18  ;;  %v1549_v37 = vmul.f32 1.442695, %v1534_v36  ;;  %v2347_v22 = vadd.f32 %v1261_v21, %v238_v9  ;;  %v1263_v23 = vpop.f32.mrb[5].mxu0 }
 0x19f   :  { %2630 = vpow2.f32 %v1545_v19  ;;  %v1551_v24 = vmul.f32 1.442695, %v1535_v20  ;;  %v2349_v38 = vadd.f32 %v1263_v23, %v242_v6  ;;  %v1265_v25 = vpop.f32.mrb[6].mxu0 }
 0x1a0   :  { %2632 = vpow2.f32 %v1549_v37  ;;  %v3357_v26 = vadd.f32 %v2347_v22, %v3226_v40  ;;  %v2351_v39 = vadd.f32 %v1265_v25, %v238_v9  ;;  %v1267_v27 = vpop.f32.mrb[7].mxu0  ;;  %v2607_v25 = vld [vmem:[%s3498_s3 + $0x98] sm:$0xff]  }
 0x1a1   :  { %2634 = vpow2.f32 %v1551_v24  ;;  %v3360_v28 = vadd.f32 %v2349_v38, %v3228_v41  ;;  %v2353_v29 = vadd.f32 %v1267_v27, %v242_v6 }
 0x1a2   :  { %v1537_v30 = vmin.f32 %v3357_v26, 20.0  ;;  %v3364_v31 = vadd.f32 %v2351_v39, %v3230_v42  ;;  %vm1525_vm1 = vcmp.gt.f32.partialorder %v3357_v26, 20.0 }
 0x1a3   :  { %v1538_v32 = vmin.f32 %v3360_v28, 20.0  ;;  %v3368_v34 = vadd.f32 %v2353_v29, %v3232_v43  ;;  %vm1526_vm5 = vcmp.gt.f32.partialorder %v3360_v28, 20.0 }
 0x1a4   :  { %v1555_v35 = vmul.f32 1.442695, %v1537_v30  ;;  %v1540_v40 = vmin.f32 %v3364_v31, 20.0  ;;  %vm1528_vm6 = vcmp.gt.f32.partialorder %v3364_v31, 20.0 }
 0x1a5   :  { %v1557_v44 = vmul.f32 1.442695, %v1538_v32  ;;  %v1541_v45 = vmin.f32 %v3368_v34, 20.0  ;;  %vm1529_vm8 = vcmp.gt.f32.partialorder %v3368_v34, 20.0 }
 0x1a6   :  { %2636 = vpow2.f32 %v1555_v35  ;;  %v1561_v41 = vmul.f32 1.442695, %v1540_v40 }
 0x1a7   :  { %2638 = vpow2.f32 %v1557_v44  ;;  %v1563_v46 = vmul.f32 1.442695, %v1541_v45 }
 0x1a8   :  { %v2629_v47 = vpop.eup %2628  ;;  %2640 = vpow2.f32 %v1561_v41 }
 0x1a9   :  { %v2631_v49 = vpop.eup %2630  ;;  %v1567_v42 = vadd.f32 1.0, %v2629_v47  ;;  %2642 = vpow2.f32 %v1563_v46  ;;  %v1570_v55 = vmul.f32 -0.5, %v2629_v47  ;;  %v1573_v60 = vand.u32 2147483647, %v2629_v47 }
 0x1aa   :  { %v2633_v50 = vpop.eup %2632  ;;  %v1576_v51 = vadd.f32 1.0, %v2631_v49  ;;  %v1579_v57 = vmul.f32 -0.5, %v2631_v49  ;;  %v1582_v11 = vand.u32 2147483647, %v2631_v49 }
 0x1ab   :  { %v2635_v53 = vpop.eup %2634  ;;  %2644 = vlog2.f32 %v1567_v42  ;;  %v1594_v43 = vadd.f32 1.0, %v2633_v50  ;;  %v1597_v2 = vmul.f32 -0.5, %v2633_v50  ;;  %v1571_v63 = vadd.f32 1.0, %v1570_v55 }
 0x1ac   :  { %2646 = vlog2.f32 %v1576_v51  ;;  %v1603_v54 = vadd.f32 1.0, %v2635_v53  ;;  %v1606_v5 = vmul.f32 -0.5, %v2635_v53  ;;  %v1580_v10 = vadd.f32 1.0, %v1579_v57 }
 0x1ad   :  { %2648 = vlog2.f32 %v1594_v43  ;;  %vm3385_vm11 = vcmp.lt.f32.partialorder %v1573_v60, 0.0004427343  ;;  %v1598_v15 = vadd.f32 1.0, %v1597_v2  ;;  %v1600_v18 = vand.u32 2147483647, %v2633_v50 }
 0x1ae   :  { %2650 = vlog2.f32 %v1603_v54  ;;  %v1607_v36 = vadd.f32 1.0, %v1606_v5  ;;  %v1609_v19 = vand.u32 2147483647, %v2635_v53  ;;  %v1572_v37 = vmul.f32 %v2629_v47, %v1571_v63 }
 0x1af   :  { %v1581_v38 = vmul.f32 %v2631_v49, %v1580_v10  ;;  %vm3393_vm14 = vcmp.lt.f32.partialorder %v1582_v11, 0.0004427343  ;;  %v1599_v30 = vmul.f32 %v2633_v50, %v1598_v15  ;;  %vm1601_vm15 = vcmp.lt.f32.partialorder %v1600_v18, 0.0004427343 }
 0x1b0   :  { %v3372_v58 = vpop.eup %2636  ;;  %v1608_v40 = vmul.f32 %v2635_v53, %v1607_v36  ;;  %vm3401_vm0 = vcmp.lt.f32.partialorder %v1609_v19, 0.0004427343 }
 0x1b1   :  { %v3374_v4 = vpop.eup %2638  ;;  %v1621_v9 = vadd.f32 1.0, %v3372_v58  ;;  %v1624_v22 = vmul.f32 -0.5, %v3372_v58  ;;  %v1627_v53 = vand.u32 2147483647, %v3372_v58 }
 0x1b2   :  { %v3377_v6 = vpop.eup %2640  ;;  %v1630_v7 = vadd.f32 1.0, %v3374_v4  ;;  %v1633_v39 = vmul.f32 -0.5, %v3374_v4  ;;  %v1636_v55 = vand.u32 2147483647, %v3374_v4 }
 0x1b3   :  { %v3382_v8 = vpop.eup %2642  ;;  %2652 = vlog2.f32 %v1621_v9  ;;  %v1648_v33 = vadd.f32 1.0, %v3377_v6  ;;  %v1651_v32 = vmul.f32 -0.5, %v3377_v6  ;;  %v1625_v49 = vadd.f32 1.0, %v1624_v22 }
 0x1b4   :  { %2654 = vlog2.f32 %v1630_v7  ;;  %v1657_v52 = vadd.f32 1.0, %v3382_v8  ;;  %v1660_v45 = vmul.f32 -0.5, %v3382_v8  ;;  %v1634_v51 = vadd.f32 1.0, %v1633_v39 }
 0x1b5   :  { %v2645_v59 = vpop.eup %2644  ;;  %2656 = vlog2.f32 %v1648_v33  ;;  %v1652_v57 = vadd.f32 1.0, %v1651_v32  ;;  %v1654_v5 = vand.u32 2147483647, %v3377_v6  ;;  %v1663_v7 = vand.u32 2147483647, %v3382_v8 }
 0x1b6   :  { %v2647_v20 = vpop.eup %2646  ;;  %v1569_v21 = vmul.f32 0.6931472, %v2645_v59  ;;  %2658 = vlog2.f32 %v1657_v52  ;;  %v1626_v11 = vmul.f32 %v3372_v58, %v1625_v49  ;;  %vm3432_vm2 = vcmp.lt.f32.partialorder %v1627_v53, 0.0004427343 }
 0x1b7   :  { %v2649_v23 = vpop.eup %2648  ;;  %v1578_v24 = vmul.f32 0.6931472, %v2647_v20  ;;  %vm3436_vm3 = vcmp.lt.f32.partialorder %v1636_v55, 0.0004427343  ;;  %v1653_v36 = vmul.f32 %v3377_v6, %v1652_v57  ;;  %vm1655_vm4 = vcmp.lt.f32.partialorder %v1654_v5, 0.0004427343 }
 0x1b8   :  { %v1575_v27 = vsel %vm3385_vm11, %v1572_v37, %v1569_v21  ;;  %v1596_v29 = vmul.f32 0.6931472, %v2649_v23  ;;  %v2651_v35 = vpop.eup %2650  ;;  %vm1664_vm7 = vcmp.lt.f32.partialorder %v1663_v7, 0.0004427343  ;;  %v2606_v37 = vld [vmem:[%s3498_s3 + $0x90] sm:$0xff]  }
 0x1b9   :  { %v1584_v46 = vsel %vm3393_vm14, %v1581_v38, %v1578_v24  ;;  %v1605_v47 = vmul.f32 0.6931472, %v2651_v35  ;;  %v1675_v42 = vsel %vm1519_vm9, %v3341_v12, %v1575_v27 }
 0x1ba   :  { %v1602_v41 = vsel %vm1601_vm15, %v1599_v30, %v1596_v29  ;;  %v1676_v2 = vsel %vm1520_vm12, %v3344_v14, %v1584_v46  ;;  %v2605_v14 = vld [vmem:[%s3498_s3 + $0x88] sm:$0xff]  }
 0x1bb   :  { %v1678_v50 = vsel %vm1522_vm10, %v3348_v16, %v1602_v41  ;;  %v1611_v43 = vsel %vm3401_vm0, %v1608_v40, %v1605_v47  ;;  %v1661_v16 = vadd.f32 1.0, %v1660_v45  ;;  %v2163_v41 = vld [vmem:[%s3499_s4] ss:$0 sm:$0xff] }
 0x1bc   :  { %v1687_v54 = vpack.c.bf16 %v1678_v50, %v1675_v42  ;;  %v1679_v12 = vsel %vm1523_vm13, %v3352_v17, %v1611_v43  ;;  %v1635_v17 = vmul.f32 %v3374_v4, %v1634_v51 }
 0x1bd   :  { %v2653_v60 = vpop.eup %2652  ;;  %v1688_v63 = vpack.c.bf16 %v1679_v12, %v1676_v2  ;;  %v1662_v20 = vmul.f32 %v3382_v8, %v1661_v16 }
 0x1be   :  { %v2655_v9 = vpop.eup %2654  ;;  %v1623_v10 = vmul.f32 0.6931472, %v2653_v60 }
 0x1bf   :  { %v2657_v33 = vpop.eup %2656  ;;  %v1632_v13 = vmul.f32 0.6931472, %v2655_v9  ;;  %1924 = vmatprep.mubr.bf16.mxu1 %v1688_v63 }
 0x1c0   :  { %v2659_v52 = vpop.eup %2658  ;;  %v1629_v58 = vsel %vm3432_vm2, %v1626_v11, %v1623_v10  ;;  %v1650_v18 = vmul.f32 0.6931472, %v2657_v33  ;;  %1925 = vmatmul.mubr.bf16.vlgmr.msra.gmra.mrb[36].mxu1 %v1687_v54 }
 0x1c1   :  { %v1638_v4 = vsel %vm3436_vm3, %v1635_v17, %v1632_v13  ;;  %v1659_v19 = vmul.f32 0.6931472, %v2659_v52  ;;  %2320 = vmatpush3.bf16.msra.mxu1 %v3294_v48  ;;  %v1681_v8 = vsel %vm1525_vm1, %v3357_v26, %v1629_v58  ;;  %v2608_v26 = vld [vmem:[%s3498_s3 + $0xa0] sm:$0xff]  }
 0x1c2   :  { %v1656_v21 = vsel %vm1655_vm4, %v1653_v36, %v1650_v18  ;;  %2321 = vmatprep.subr.bf16.mxu1 %v2605_v14  ;;  %v1682_v23 = vsel %vm1526_vm5, %v3360_v28, %v1638_v4  ;;  %v2609_v28 = vld [vmem:[%s3498_s3 + $0xa8] sm:$0xff]  }
 0x1c3   :  { %v1665_v6 = vsel %vm1664_vm7, %v1662_v20, %v1659_v19  ;;  %v1684_v22 = vsel %vm1528_vm6, %v3364_v31, %v1656_v21  ;;  %v2610_v31 = vld [vmem:[%s3498_s3 + $0xb0] sm:$0xff]  }
 0x1c4   :  { %v1685_v48 = vsel %vm1529_vm8, %v3368_v34, %v1665_v6  ;;  %v1690_v24 = vpack.c.bf16 %v1684_v22, %v1681_v8 }
 0x1c5   :  { %v1691_v38 = vpack.c.bf16 %v1685_v48, %v1682_v23  ;;  %2322 = vmatpush3.bf16.msra.mxu1 %v2605_v14 }
 0x1c6   :  { %2323 = vmatprep.subr.bf16.mxu1 %v2606_v37 }
 0x1c7   :  { %1932 = vmatprep.mubr.bf16.mxu1 %v1691_v38 }
 0x1c8   :  { %1933 = vmatmul.mubr.bf16.gmra.mrb[40].mxu1 %v1690_v24 }
 0x1c9   :  { %2324 = vmatpush3.bf16.msra.mxu1 %v2606_v37  ;;  %2335 = vmatprep.mubr.bf16.mxu1 %v1689_v3 }
 0x1ca   :  { %2325 = vmatprep.subr.bf16.mxu1 %v2607_v25 }
 0x1cd   :  { %2326 = vmatpush3.bf16.msra.mxu1 %v2607_v25 }
 0x1ce   :  { %2327 = vmatprep.subr.bf16.mxu1 %v2608_v26 }
 0x1d1   :  { %2328 = vmatpush3.bf16.msra.mxu1 %v2608_v26 }
 0x1d2   :  { %2329 = vmatprep.subr.bf16.mxu1 %v2609_v28 }
 0x1d5   :  { %2330 = vmatpush3.bf16.msra.mxu1 %v2609_v28 }
 0x1d6   :  { %2331 = vmatprep.subr.bf16.mxu1 %v2610_v31 }
 0x1d9   :  { %2332 = vmatpush3.bf16.msra.mxu1 %v2610_v31 }
 0x1da   :  { %2333 = vmatprep.subr.bf16.mxu1 %v2611_v0 }
 0x1dd   :  { %2334 = vmatpush3.bf16.msra.mxu1 %v2611_v0 }
 0x1e0   :  { %2336 = vmatmul.mubr.bf16.vlgmr.msra.gmra.mrb[44].mxu1 %v1692_v1 }
 0x293   :  { %v2291_v61 = vpop.f32.mrb[36].mxu1 }
 0x294   :  { %v2292_v3 = vpop.f32.mrb[37].mxu1 }
 0x295   :  { %v2293_v34 = vadd.f32 %v2292_v3, %v2291_v61  ;;  %v2294_v39 = vpop.f32.mrb[38].mxu1 }
 0x296   :  { %v2295_v27 = vpop.f32.mrb[39].mxu1 }
 0x297   :  { %v2296_v29 = vadd.f32 %v2295_v27, %v2294_v39  ;;  %v1927_v56 = vadd.f32 %v2293_v34, %v2163_v41 }
 0x299   :  { %v1930_v51 = vadd.f32 %v2296_v29, %v2163_v41 }
 0x29b   :  { %v2297_v30 = vpop.f32.mrb[40].mxu1 }
 0x29c   :  { %v2298_v32 = vpop.f32.mrb[41].mxu1 }
 0x29d   :  { %v2299_v35 = vadd.f32 %v2298_v32, %v2297_v30  ;;  %v2300_v40 = vpop.f32.mrb[42].mxu1 }
 0x29e   :  { %v2301_v44 = vpop.f32.mrb[43].mxu1 }
 0x29f   :  { %v2302_v45 = vadd.f32 %v2301_v44, %v2300_v40  ;;  %v1935_v46 = vadd.f32 %v2299_v35, %v2163_v41 }
 0x2a1   :  { %v1938_v49 = vadd.f32 %v2302_v45, %v2163_v41 }
 0x2b3   :  { %v2337_v47 = vpop.f32.mrb[44].mxu1 }
 0x2b4   :  { %v1984_v62 = vadd.f32 %v2337_v47, %v1935_v46  ;;  %v1975_v1 = vpop.f32.mrb[45].mxu1 }
 0x2b5   :  { %v1976_v42 = vadd.f32 %v1975_v1, %v1927_v56  ;;  %v2338_v50 = vpop.f32.mrb[46].mxu1 }
 0x2b6   :  { %1992 = vst [vmem:[%s3500_s5 + $0x10] sm:$0xff] %v1984_v62  ;;  %v1987_v53 = vadd.f32 %v2338_v50, %v1938_v49  ;;  %v1978_v43 = vpop.f32.mrb[47].mxu1 }
 0x2b7   :  { %1990 = vst [vmem:[%s3500_s5] sm:$0xff] %v1976_v42  ;;  %v1979_v54 = vadd.f32 %v1978_v43, %v1930_v51 }
 0x2b8   :  { %1993 = vst [vmem:[%s3500_s5 + $0x18] sm:$0xff] %v1987_v53 }
 0x2b9   :  { %1991 = vst [vmem:[%s3500_s5 + $0x8] sm:$0xff] %v1979_v54 }

</bundles_post_ra>
